<compile_context>
chip_gen: v6e
topology: v6e:2x2x1
jax: 0.10.0
libtpu: 0.0.40
codegen_flags: <defaults>
</compile_context>

<pallas_src>
import jax
import jax.numpy as jnp
from jax.experimental import pallas as pl
from jax.experimental.pallas import tpu as pltpu


# --------------------------------------------------------------------------
# Pallas kernel: fused (conv3x3 as matmul) + bias + ReLU + conv1x1 + bias,
# computed in the transposed (channel-sublane, anchor-lane) layout.
# --------------------------------------------------------------------------
def _head_level_kernel(p_ref, w1_ref, b1_ref, w2_ref, b2_ref, o_ref):
    # p_ref : (1, 9C, TM)  bf16  im2col patches, row = (ky*3+kx)*C + c
    # w1_ref: (C2, 9C)     bf16  3x3 conv weights (same column order)
    # b1_ref: (C2, 1)      f32
    # w2_ref: (P,  C2)     bf16  1x1 conv weights
    # b2_ref: (P,  1)      f32
    # o_ref : (1, P, TM)   f32
    patches_t = p_ref[0]                                             # (9C, TM)
    h = jnp.dot(w1_ref[...], patches_t,
                preferred_element_type=jnp.float32)                  # (C2, TM)
    h = jnp.maximum(h + b1_ref[...], 0.0)                            # f32 bias+ReLU
    y = jnp.dot(w2_ref[...], h.astype(jnp.bfloat16),
                preferred_element_type=jnp.float32) + b2_ref[...]    # (P, TM)
    o_ref[0] = y.astype(o_ref.dtype)


def _pick_tile(hw, c, p, budget_bytes=24 << 20):
    """VMEM-budgeted anchor tile: double-buffered bf16 patches + f32 output."""
    per_anchor = 2 * (9 * c * 2) + 2 * (p * 4)          # bytes per anchor column
    tm_cap = max(128, budget_bytes // per_anchor)
    tm_cap = min(tm_cap, 512)                           # 256-512 sweet spot
    if hw <= 128:
        return hw                                       # full-extent block is legal
    t = (min(tm_cap, hw) // 128) * 128
    while t >= 128:
        if hw % t == 0:
            return t
        t -= 128
    # TODO(synk): ragged HW (no 128-multiple divisor) falls back to one block.
    return hw


# --------------------------------------------------------------------------
# Per-level wrapper: bf16 im2col (cheap XLA data movement) + fused kernel.
# --------------------------------------------------------------------------
def fcos_head_level(x, w1, b1, w2, b2):
    """One FPN level: x (B, C, H, W) -> (B, pdim, H*W), f32."""
    B, C, H, W = x.shape
    C2 = w1.shape[0]
    P = w2.shape[0]
    HW = H * W
    bf16 = jnp.bfloat16
    f32 = jnp.float32

    # im2col directly in NCHW, bf16, transposed layout (B, 9C, HW).
    xp = jnp.pad(x.astype(bf16), ((0, 0), (0, 0), (1, 1), (1, 1)))
    taps = [xp[:, :, ky:ky + H, kx:kx + W]
            for ky in range(3) for kx in range(3)]                 # 9 x (B,C,H,W)
    patches_t = jnp.stack(taps, axis=1).reshape(B, 9 * C, HW)      # (B, 9C, HW)

    # Weights packed to match tap-major / channel-minor patch rows.
    w1t = jnp.transpose(w1, (0, 2, 3, 1)).reshape(C2, 9 * C).astype(bf16)
    b1m = b1.astype(f32).reshape(C2, 1)
    w2t = w2.reshape(P, C2).astype(bf16)
    b2m = b2.astype(f32).reshape(P, 1)

    TM = _pick_tile(HW, C, P)
    grid = (B, HW // TM)

    flops = 2 * B * HW * (9 * C * C2 + C2 * P)
    bytes_accessed = (patches_t.size * 2 + w1t.size * 2 + w2t.size * 2
                      + b1m.size * 4 + b2m.size * 4 + B * P * HW * 4)

    out = pl.pallas_call(
        _head_level_kernel,
        out_shape=jax.ShapeDtypeStruct((B, P, HW), f32),
        grid=grid,
        in_specs=[
            pl.BlockSpec((1, 9 * C, TM), lambda b, m: (b, 0, m)),
            pl.BlockSpec((C2, 9 * C), lambda b, m: (0, 0)),
            pl.BlockSpec((C2, 1), lambda b, m: (0, 0)),
            pl.BlockSpec((P, C2), lambda b, m: (0, 0)),
            pl.BlockSpec((P, 1), lambda b, m: (0, 0)),
        ],
        out_specs=pl.BlockSpec((1, P, TM), lambda b, m: (b, 0, m)),
        compiler_params=pltpu.CompilerParams(
            dimension_semantics=("parallel", "parallel"),
            vmem_limit_bytes=32 * 1024 * 1024),
        cost_estimate=pl.CostEstimate(
            flops=flops, transcendentals=0, bytes_accessed=bytes_accessed),
    )(patches_t, w1t, b1m, w2t, b2m)
    return out


def fcos_head_forward(inputs, params):
    """FcosHead_v1.forward: list of (B, C_i, H_i, W_i) -> (B, N, pdim)."""
    res = [fcos_head_level(x, *p) for x, p in zip(inputs, params)]
    # Mirrors torch.cat(res, dim=-1).permute(0, 2, 1); (B, 9, N) transpose is
    # negligible next to the kernel DMA.
    return jnp.transpose(jnp.concatenate(res, axis=-1), (0, 2, 1))


# --------------------------------------------------------------------------
# Pure-XLA reference (same bf16 operand / f32 accumulation recipe).
# --------------------------------------------------------------------------
def _reference_level(x, w1, b1, w2, b2):
    bf16 = jnp.bfloat16
    y = jax.lax.conv_general_dilated(
        x.astype(bf16), w1.astype(bf16), (1, 1), "SAME",
        dimension_numbers=("NCHW", "OIHW", "NCHW"),
        preferred_element_type=jnp.float32)
    y = jax.nn.relu(y + b1[None, :, None, None])
    y = jax.lax.conv_general_dilated(
        y.astype(bf16), w2.astype(bf16), (1, 1), "SAME",
        dimension_numbers=("NCHW", "OIHW", "NCHW"),
        preferred_element_type=jnp.float32)
    y = y + b2[None, :, None, None]
    return y.reshape(y.shape[0], y.shape[1], -1)                   # (B, P, HW)


if __name__ == "__main__":
    NUM_CLASSES = 3
    PDIM = 1 + NUM_CLASSES + 1 + 4                   # = 9, as in FcosHead_v1
    B = 2
    in_channels_list = (16, 32, 64)
    spatial = (16, 8, 4)                             # N = 256 + 64 + 16 = 336

    key = jax.random.PRNGKey(0)
    inputs, params = [], []
    for c, s in zip(in_channels_list, spatial):
        key, kx, kw1, kb1, kw2, kb2 = jax.random.split(key, 6)
        inputs.append(jax.random.normal(kx, (B, c, s, s), dtype=jnp.float32))
        w1 = jax.random.normal(kw1, (2 * c, c, 3, 3), jnp.float32) / (3.0 * (c ** 0.5))
        b1 = 0.1 * jax.random.normal(kb1, (2 * c,), jnp.float32)
        w2 = jax.random.normal(kw2, (PDIM, 2 * c, 1, 1), jnp.float32) / ((2.0 * c) ** 0.5)
        b2 = 0.1 * jax.random.normal(kb2, (PDIM,), jnp.float32)
        params.append((w1, b1, w2, b2))

    out = fcos_head_forward(inputs, params)
    jax.block_until_ready(out)

    ref = jnp.transpose(
        jnp.concatenate(
            [_reference_level(x, *p) for x, p in zip(inputs, params)], axis=-1),
        (0, 2, 1))
    assert out.shape == (B, sum(s * s for s in spatial), PDIM), out.shape
    if not bool(jnp.allclose(out, ref, atol=2e-2, rtol=2e-2)):
        err = float(jnp.max(jnp.abs(out - ref)))
        raise AssertionError(f"Pallas FCOS head mismatch, max abs err {err}")
    print("KERNEL_OK")
</pallas_src>

<mosaic_0001>
module attributes {stable_mosaic.version = 11 : i64} {
  func.func @_head_level_kernel(%arg0: i32, %arg1: i32, %arg2: memref<1x144x256xbf16, #tpu.memory_space<vmem>>, %arg3: memref<32x144xbf16, #tpu.memory_space<vmem>>, %arg4: memref<32x1xf32, #tpu.memory_space<vmem>>, %arg5: memref<9x32xbf16, #tpu.memory_space<vmem>>, %arg6: memref<9x1xf32, #tpu.memory_space<vmem>>, %arg7: memref<1x9x256xf32, #tpu.memory_space<vmem>>) attributes {dimension_semantics = [#tpu.dimension_semantics<parallel>, #tpu.dimension_semantics<parallel>], iteration_bounds = array<i64: 2, 1>, scalar_prefetch = 0 : i64, scratch_operands = 0 : i64, tpu.core_type = #tpu.core_type<tc>, window_params = [{transform_indices = @transform_0, window_bounds = array<i64: 1, 144, 256>}, {pipeline_mode = #tpu.pipeline_mode<synchronous>, transform_indices = @transform_1, window_bounds = array<i64: 32, 144>}, {pipeline_mode = #tpu.pipeline_mode<synchronous>, transform_indices = @transform_2, window_bounds = array<i64: 32, 1>}, {pipeline_mode = #tpu.pipeline_mode<synchronous>, transform_indices = @transform_3, window_bounds = array<i64: 9, 32>}, {pipeline_mode = #tpu.pipeline_mode<synchronous>, transform_indices = @transform_4, window_bounds = array<i64: 9, 1>}, {transform_indices = @transform_5, window_bounds = array<i64: 1, 9, 256>}]} {
    %c0 = arith.constant 0 : index
    %c0_0 = arith.constant 0 : index
    %c0_1 = arith.constant 0 : index
    %0 = vector.load %arg2[%c0, %c0_0, %c0_1] : memref<1x144x256xbf16, #tpu.memory_space<vmem>>, vector<1x144x256xbf16>
    %1 = vector.shape_cast %0 : vector<1x144x256xbf16> to vector<144x256xbf16>
    %c0_2 = arith.constant 0 : index
    %c0_3 = arith.constant 0 : index
    %2 = vector.load %arg3[%c0_2, %c0_3] : memref<32x144xbf16, #tpu.memory_space<vmem>>, vector<32x144xbf16>
    %cst = arith.constant dense<0.000000e+00> : vector<32x256xf32>
    %3 = tpu.matmul %2, %1, %cst {dimension_numbers = #tpu.dot_dimension_numbers<[1], [0], [0], [1], [0, 0, 1, 1], [], []>} : vector<32x144xbf16>, vector<144x256xbf16>, vector<32x256xf32> -> vector<32x256xf32>
    %c0_4 = arith.constant 0 : index
    %c0_5 = arith.constant 0 : index
    %4 = vector.load %arg4[%c0_4, %c0_5] : memref<32x1xf32, #tpu.memory_space<vmem>>, vector<32x1xf32>
    %5 = vector.broadcast %4 : vector<32x1xf32> to vector<32x256xf32>
    %6 = arith.addf %3, %5 : vector<32x256xf32>
    %cst_6 = arith.constant 0.000000e+00 : f32
    %7 = vector.broadcast %cst_6 : f32 to vector<32x256xf32>
    %8 = arith.maximumf %6, %7 : vector<32x256xf32>
    %c0_7 = arith.constant 0 : index
    %c0_8 = arith.constant 0 : index
    %9 = vector.load %arg5[%c0_7, %c0_8] : memref<9x32xbf16, #tpu.memory_space<vmem>>, vector<9x32xbf16>
    %10 = arith.truncf %8 : vector<32x256xf32> to vector<32x256xbf16>
    %cst_9 = arith.constant dense<0.000000e+00> : vector<9x256xf32>
    %11 = tpu.matmul %9, %10, %cst_9 {dimension_numbers = #tpu.dot_dimension_numbers<[1], [0], [0], [1], [0, 0, 1, 1], [], []>} : vector<9x32xbf16>, vector<32x256xbf16>, vector<9x256xf32> -> vector<9x256xf32>
    %c0_10 = arith.constant 0 : index
    %c0_11 = arith.constant 0 : index
    %12 = vector.load %arg6[%c0_10, %c0_11] : memref<9x1xf32, #tpu.memory_space<vmem>>, vector<9x1xf32>
    %13 = vector.broadcast %12 : vector<9x1xf32> to vector<9x256xf32>
    %14 = arith.addf %11, %13 : vector<9x256xf32>
    %c0_12 = arith.constant 0 : index
    %c0_13 = arith.constant 0 : index
    %c0_14 = arith.constant 0 : index
    %15 = vector.load %arg7[%c0_12, %c0_13, %c0_14] : memref<1x9x256xf32, #tpu.memory_space<vmem>>, vector<1x9x256xf32>
    %16 = vector.shape_cast %15 : vector<1x9x256xf32> to vector<9x256xf32>
    %17 = vector.shape_cast %14 : vector<9x256xf32> to vector<1x9x256xf32>
    tpu.vector_store %arg7[%c0_12, %c0_13, %c0_14], %17 {strides = array<i32>} : memref<1x9x256xf32, #tpu.memory_space<vmem>>, vector<1x9x256xf32>,
    return
  }
  func.func @transform_0(%arg0: i32, %arg1: i32) -> (i32, i32, i32) {
    %c0_i32 = arith.constant 0 : i32
    %c0_i32_0 = arith.constant 0 : i32
    return %arg0, %c0_i32, %arg1 : i32, i32, i32
  }
  func.func @transform_1(%arg0: i32, %arg1: i32) -> (i32, i32) {
    %c0_i32 = arith.constant 0 : i32
    %c0_i32_0 = arith.constant 0 : i32
    %c0_i32_1 = arith.constant 0 : i32
    return %c0_i32, %c0_i32_0 : i32, i32
  }
  func.func @transform_2(%arg0: i32, %arg1: i32) -> (i32, i32) {
    %c0_i32 = arith.constant 0 : i32
    %c0_i32_0 = arith.constant 0 : i32
    %c0_i32_1 = arith.constant 0 : i32
    return %c0_i32, %c0_i32_0 : i32, i32
  }
  func.func @transform_3(%arg0: i32, %arg1: i32) -> (i32, i32) {
    %c0_i32 = arith.constant 0 : i32
    %c0_i32_0 = arith.constant 0 : i32
    %c0_i32_1 = arith.constant 0 : i32
    return %c0_i32, %c0_i32_0 : i32, i32
  }
  func.func @transform_4(%arg0: i32, %arg1: i32) -> (i32, i32) {
    %c0_i32 = arith.constant 0 : i32
    %c0_i32_0 = arith.constant 0 : i32
    %c0_i32_1 = arith.constant 0 : i32
    return %c0_i32, %c0_i32_0 : i32, i32
  }
  func.func @transform_5(%arg0: i32, %arg1: i32) -> (i32, i32, i32) {
    %c0_i32 = arith.constant 0 : i32
    %c0_i32_0 = arith.constant 0 : i32
    return %arg0, %c0_i32, %arg1 : i32, i32, i32
  }
}

</mosaic_0001>

<bundles_post_ra>
// kernel: tpu_custom_call.1
= control target key start
LH: loop header
LB: loop body
LE: loop exit
PB: predicated region body
PF: predicated region fallthrough
CT: control target
= control target key end

     0   :  { %10 = vsyncpa [#allocation3], 0  ;;  %s1058_s0 = inlined_call_operand.hbm [shape: bf16[2,144,256], index: 0, kind: input, shape index: {}]   ;;  %s1059_s1 = inlined_call_operand.vmem [shape: bf16[32,144], index: 1, kind: input, shape index: {}]   ;;  %s1060_s2 = inlined_call_operand.vmem [shape: f32[32,1], index: 2, kind: input, shape index: {}]   ;;  %s1061_s3 = inlined_call_operand.vmem [shape: bf16[9,32], index: 3, kind: input, shape index: {}]   ;;  %s1062_s4 = inlined_call_operand.vmem [shape: f32[9,1], index: 4, kind: input, shape index: {}]   ;;  %s1063_s5 = inlined_call_operand.vmem [shape: f32[2,9,256], index: 5, kind: output, shape index: {}]  }
   0x1   :  { %12 = vsyncpa [#allocation3 + $0x1], 0  ;;  %s913_s18 = smov 0   ;;  %s915_s19 = smov 0  }
   0x2   :  { %s917_s20 = smov 0   ;;  %s919_s21 = smov 0  }
   0x3   :  { %s921_s22 = smov 0   ;;  %s923_s23 = smov 0  }
   0x4 LB: > { %s665_s24 = sadd.s32 4294967295, %s877_s23   ;;  %s30_s25 = sadd.s32 1, %s873_s22  ;;  %s877_s23 = sphi %s923_s23, %s18_s23   ;;  %s873_s22 = sphi %s921_s22, %s1070_s22   ;;  %s869_s21 = sphi %s919_s21, %s1069_s21   ;;  %s865_s20 = sphi %s917_s20, %s1068_s20   ;;  %s861_s19 = sphi %s915_s19, %s1067_s19   ;;  %s857_s18 = sphi %s913_s18, %s1066_s18  }
   0x5   : > { %p32_p0 = scmp.ge.s32.totalorder %s30_s25, 2  ;;  %s39_s26 = sadd.s32 1, %s865_s20 }
   0x6   : > { %p46_p1 = scmp.ne.s32.totalorder %s865_s20, %s861_s19  ;;  %p47_p2 = scmp.eq.s32.totalorder %s877_s23, 0 }
   0x7   : > { %s1072_s25 = smov (%p32_p0, %s30_s25), 0  ;;  %p52_p4 = scmp.ne.s32.totalorder %s861_s19, %s857_s18 }
   0x8   : > { %p48_p3 = por %p47_p2, %p46_p1  ;;  %s34_s27 = ssub.s32 %s873_s22, %s1072_s25 }
   0x9   : > { %p53_p5 = scmp.eq.s32.totalorder %s665_s24, 0  ;;  %p37_p6 = scmp.eq.s32.totalorder %s34_s27, 0 }
   0xa   : > { %p711_p8 = scmp.lt.s32.totalorder %s877_s23, 2  ;;  %s200_s30 = sand.u32 1, %s865_s20  }
   0xb   : > { %p952_p7 = por %p53_p5, %p52_p4  ;;  %s703_s6 = smul.u32 2304, %s873_s22 }
   0xc   : > { %s958_s29 = scalar_select %p37_p6, %s865_s20, %s39_s26  }
   0xd   : > { %s702_s7 = smul.u32 144, %s200_s30  ;;  %s212_s10 = scalar_lea.hbm %s1058_s0, %s703_s6 }
   0xe   : > { %p965_p9 = pnand %p711_p8, %p48_p3  ;;  %s201_s14 = scalar_lea.sflag [#allocation3], %s200_s30 }
   0xf   : > { %s204_s12 = scalar_lea.vmem [#allocation2], %s702_s7  ;;  %s879_s16 = smov [#allocation2]  }
  0x10   : > { %s213_s13 = sshll.u32 %s204_s12, 4  ;;  %p801_p10 = pneg %p965_p9  ;;  %s214_s13 = int_to_ptr.vmem [resolvable:$true] %s213_s13 }
  0x11   : > { %s812_s15 = scalar_lea.vmem %s214_s13, 2304  ;;  %s817_s17 = sshll.u32 %s879_s16, 4  ;;  %s818_s17 = int_to_ptr.vmem [resolvable:$false] %s817_s17 }
  0x12   : > { %p813_p11 = scmp.ne.s32.totalorder %s214_s13, %s812_s15  ;;  %s819_s18 = scalar_lea.vmem %s818_s17, 4608 }
  0x13   : > { %p820_p0 = scmp.lt.s32.totalorder %s214_s13, %s818_s17  ;;  %p821_p1 = scmp.lt.s32.totalorder %s819_s18, %s812_s15 }
  0x14   : > { %p815_p12 = pnand %p813_p11, %p801_p10 }
  0x15   : > { %p822_p2 = por %p821_p1, %p820_p0 }
  0x16   : > { %p816_p13 = pneg %p815_p12 }
  0x18   : > { %p823_p3 = pnand %p822_p2, %p816_p13 }
  0x1a   : > { %826 = shalt.err (!%p823_p3)
}
  0x1b   : > { %s880_s24 = smov 128   ;;  %s881_s26 = smov 8  }
  0x1c   : > { %710 = dma.hbm_to_vmem [thread:$0]  (!%p965_p9), %s212_s10, 2304, %s214_s13, %s201_s14, %s880_s24, %s880_s24, %s881_s26  }
  0x1d   : > { %p670_p4 = scmp.ge.s32.totalorder %s877_s23, 1  ;;  %p221_p5 = scmp.lt.s32.totalorder %s877_s23, 3 }
  0x1f   : > { %p222_p6 = pnand %p670_p4, %p221_p5 }
  0x20   : > { %s227_s27 = sand.u32 (!%p222_p6), 1, %s861_s19  }
  0x21   : > { %225 = sbr.rel (%p222_p6) target bundleno = 500 (0x1f4), region = 40  ;;  %s228_s6 = scalar_lea.sflag (!%p222_p6), [#allocation3], %s227_s27 }
  0x22   : > { %s704_s30 = smul.u32 (!%p222_p6), 144, %s227_s27 }
  0x24   : > { %s976_s7 = scalar_lea.vmem (!%p222_p6), [#allocation2], %s704_s30 }
  0x26   : > { %852 = dma.done.wait (%p952_p7), %s228_s6, 2304  }
  0x27   : > { %854 = vsyncadd (%p952_p7), %s228_s6, 4294964992  ;;  %v882_v0 = vmov 0   ;;  %v765_v1 = vld [vmem:[%s976_s7 + $0x74] ss:$8 sps:$4 sm:$0xff]   ;;  %v767_v2 = vld [vmem:[%s976_s7 + $0x70] ss:$8 sps:$4 sm:$0xff]  }
  0x28   : > { %764 = vset.pattern.permute.xlu1 %v882_v0  ;;  %763 = vset.pattern.permute.xlu0 %v882_v0  ;;  %v768_v3 = vld [vmem:[%s976_s7 + $0x64] ss:$8 sps:$4 sm:$0xff]   ;;  %v770_v4 = vld [vmem:[%s976_s7 + $0x60] ss:$8 sps:$4 sm:$0xff]   ;;  %v771_v5 = vld [vmem:[%s976_s7 + $0x54] ss:$8 sps:$4 sm:$0xff]  }
  0x29   : > { %555 = vmatprep.mubr.bf16.mxu1 %v882_v0  ;;  %435 = vmatprep.subr.bf16.mxu0 %v765_v1  ;;  %v773_v6 = vld [vmem:[%s976_s7 + $0x50] ss:$8 sps:$4 sm:$0xff]   ;;  %v774_v7 = vld [vmem:[%s976_s7 + $0x44] ss:$8 sps:$4 sm:$0xff]   ;;  %v776_v8 = vld [vmem:[%s976_s7 + $0x40] ss:$8 sps:$4 sm:$0xff]  }
  0x2a   : > { %436 = vmatpush1.bf16.msra.mxu0 %v767_v2  ;;  %v777_v9 = vld [vmem:[%s976_s7 + $0x34] ss:$8 sps:$4 sm:$0xff]   ;;  %vm428_vm0 = vcmask 130048   ;;  %v779_v12 = vld [vmem:[%s976_s7 + $0x30] ss:$8 sps:$4 sm:$0xff]   ;;  %vm519_vm1 = vcmask 261120  }
  0x2b   : > { %437 = vmatprep.subr.bf16.mxu0 %v768_v3  ;;  %v794_v10 = vld [vmem:[%s1059_s1 + $0x4] ss:$8 sps:$4 sm:$0xff]   ;;  %v298_v13 = vld [vmem:[%s1060_s2 + $0x10] sm:$0xff]  ;;  %v299_v16 = vld [vmem:[%s1060_s2 + $0x18] sm:$0xff]  ;;  %p264_p7 = scmp.lt.s32.totalorder %s869_s21, 1 }
  0x2c   : > { %v296_v11 = vld [vmem:[%s1060_s2] sm:$0xff]  ;;  %695 = vmatprep.mubr.msk.bf16.mxu0 %vm428_vm0, %v794_v10  ;;  %312 = vperm.xlu0 %763, %v298_v13   ;;  %v297_v15 = vld [vmem:[%s1060_s2 + $0x8] sm:$0xff]  ;;  %v795_v27 = vld [vmem:[%s1059_s1 + $0x14] ss:$8 sps:$4 sm:$0xff]  }
  0x2d   : > { %v780_v14 = vld [vmem:[%s976_s7 + $0x24] ss:$8 sps:$4 sm:$0xff]   ;;  %302 = vperm.xlu1 %764, %v296_v11   ;;  %v782_v17 = vld [vmem:[%s976_s7 + $0x20] ss:$8 sps:$4 sm:$0xff]   ;;  %v783_v18 = vld [vmem:[%s976_s7 + $0x14] ss:$8 sps:$4 sm:$0xff]  }
  0x2e   : > { %438 = vmatpush1.bf16.msra.mxu0 %v770_v4  ;;  %v503_v19 = vld [vmem:[%s1062_s4 + $0x8] sm:$0x1]  ;;  %v502_v20 = vld [vmem:[%s1062_s4] sm:$0xff]  ;;  %v797_v28 = vld [vmem:[%s1059_s1 + $0x10] ss:$8 sps:$4 sm:$0xff]   ;;  %s1074_s21 = smov (!%p264_p7, %s869_s21), 1 }
  0x2f   : > { %439 = vmatprep.subr.bf16.mxu0 %v771_v5  ;;  %v785_v21 = vld [vmem:[%s976_s7 + $0x10] ss:$8 sps:$4 sm:$0xff]   ;;  %v786_v22 = vld [vmem:[%s976_s7 + $0x4] ss:$8 sps:$4 sm:$0xff]   ;;  %v788_v23 = vld [vmem:[%s976_s7] ss:$8 sps:$4 sm:$0xff]  }
  0x30   : > { %317 = vperm.xlu0 %763, %v299_v16   ;;  %v789_v24 = vld [vmem:[%s976_s7 + $0x84] ss:$8 sps:$4 sm:$0xff]   ;;  %v791_v25 = vld [vmem:[%s976_s7 + $0x80] ss:$8 sps:$4 sm:$0xff]   ;;  %s701_s11 = sshll.u32 %s1074_s21, 5 }
  0x31   : > { %307 = vperm.xlu1 %764, %v297_v15   ;;  %v792_v26 = vld [vmem:[%s1059_s1] ss:$8 sps:$4 sm:$0xff]   ;;  %s271_s14 = scalar_lea.vmem %s1063_s5, %s701_s11 }
  0x32   : > { %440 = vmatpush1.bf16.msra.mxu0 %v773_v6  ;;  %v798_v61 = vld [vmem:[%s1061_s3] sm:$0x1f]  }
  0x33   : > { %441 = vmatprep.subr.bf16.mxu0 %v774_v7 }
  0x34   : > { %506 = vperm.xlu0 %763, %v502_v20  }
  0x35   : > { %511 = vperm.xlu1 %764, %v503_v19  }
  0x36   : > { %442 = vmatpush1.bf16.msra.mxu0 %v776_v8 }
  0x37   : > { %443 = vmatprep.subr.bf16.mxu0 %v777_v9 }
  0x3a   : > { %444 = vmatpush1.bf16.msra.mxu0 %v779_v12 }
  0x3b   : > { %445 = vmatprep.subr.bf16.mxu0 %v780_v14 }
  0x3e   : > { %446 = vmatpush1.bf16.msra.mxu0 %v782_v17 }
  0x3f   : > { %447 = vmatprep.subr.bf16.mxu0 %v783_v18 }
  0x42   : > { %448 = vmatpush1.bf16.msra.mxu0 %v785_v21 }
  0x43   : > { %449 = vmatprep.subr.bf16.mxu0 %v786_v22 }
  0x46   : > { %450 = vmatpush1.bf16.msra.mxu0 %v788_v23 }
  0x47   : > { %465 = vmatprep.subr.bf16.mxu0 %v789_v24 }
  0x4a   : > { %466 = vmatpush2.bf16.msra.mxu0 %v791_v25 }
  0x4d   : > { %468 = vmatmul.mubr.bf16.vlgmr.msra.gmra.mxu0 %v792_v26 }
  0x4e   : > { %696 = vmatprep.mubr.msk.bf16.mxu0 %vm428_vm0, %v795_v27 }
  0x55   : > { %478 = vmatmul.mubr.bf16.gmra.mxu0 %v797_v28 }
  0xa7   : > { %v313_v33 = vpop.permute.xlu0 %312 }
  0xa8   : > { %v303_v32 = vpop.permute.xlu1 %302 }
  0xab   : > { %v318_v38 = vpop.permute.xlu0 %317 }
  0xac   : > { %v308_v37 = vpop.permute.xlu1 %307 }
  0xaf   : > { %v507_v62 = vpop.permute.xlu0 %506 }
  0xb0   : > { %v512_v3 = vpop.permute.xlu1 %511 }
 0x10d   : > { %v469_v29 = vpop.f32.mrf.mxu0 }
 0x10e   : > { %v470_v52 = vadd.f32 %v469_v29, %v303_v32 }
 0x10f   : > { %v471_v30 = vpop.f32.mrf.mxu0 }
 0x110   : > { %v472_v45 = vadd.f32 %v471_v30, %v303_v32  ;;  %v488_v59 = vmax.f32 %v470_v52, 0.0 }
 0x111   : > { %v473_v31 = vpop.f32.mrf.mxu0 }
 0x112   : > { %v474_v47 = vadd.f32 %v473_v31, %v308_v37  ;;  %v489_v54 = vmax.f32 %v472_v45, 0.0 }
 0x113   : > { %v475_v34 = vpop.f32.mrf.mxu0 }
 0x114   : > { %v476_v40 = vadd.f32 %v475_v34, %v308_v37  ;;  %v490_v56 = vmax.f32 %v474_v47, 0.0 }
 0x115   : > { %v479_v35 = vpop.f32.mrf.mxu0 }
 0x116   : > { %v480_v43 = vadd.f32 %v479_v35, %v313_v33  ;;  %v491_v49 = vmax.f32 %v476_v40, 0.0  ;;  %v498_v60 = vpack.c.bf16 %v490_v56, %v488_v59 }
 0x117   : > { %v481_v36 = vpop.f32.mrf.mxu0 }
 0x118   : > { %v482_v41 = vadd.f32 %v481_v36, %v313_v33  ;;  %v492_v53 = vmax.f32 %v480_v43, 0.0  ;;  %v499_v58 = vpack.c.bf16 %v491_v49, %v489_v54 }
 0x119   : > { %v483_v39 = vpop.f32.mrf.mxu0 }
 0x11a   : > { %v484_v42 = vadd.f32 %v483_v39, %v318_v38  ;;  %v493_v50 = vmax.f32 %v482_v41, 0.0 }
 0x11b   : > { %v485_v44 = vpop.f32.mrf.mxu0 }
 0x11c   : > { %v486_v46 = vadd.f32 %v485_v44, %v318_v38  ;;  %v494_v48 = vmax.f32 %v484_v42, 0.0 }
 0x11e   : > { %v495_v51 = vmax.f32 %v486_v46, 0.0  ;;  %v500_v57 = vpack.c.bf16 %v494_v48, %v492_v53 }
 0x120   : > { %v501_v55 = vpack.c.bf16 %v495_v51, %v493_v50 }
 0x122   : > { %535 = vmatprep.subr.bf16.mxu1 %v501_v55 }
 0x123   : > { %536 = vmatpush1.bf16.msra.mxu1 %v500_v57 }
 0x124   : > { %537 = vmatprep.subr.bf16.mxu1 %v499_v58 }
 0x127   : > { %538 = vmatpush1.bf16.msra.mxu1 %v498_v60 }
 0x12a   : > { %698 = vmatmul.mubr.msk.bf16.vlgmr.msra.gmra.mxu1 %vm519_vm1, %v798_v61 }
 0x1ea   : > { %v557_v63 = vpop.f32.mrf.mxu1 }
 0x1eb   : > { %v558_v0 = vadd.f32 %v557_v63, %v507_v62 }
 0x1ec   : > { %v559_v1 = vpop.f32.mrf.mxu1 }
 0x1ed   : > { %566 = vst [vmem:[%s271_s14] sm:$0xff] %v558_v0  ;;  %v560_v2 = vadd.f32 %v559_v1, %v507_v62 }
 0x1ee   : > { %v561_v4 = vpop.f32.mrf.mxu1 }
 0x1ef   : > { %567 = vst [vmem:[%s271_s14 + $0x8] sm:$0xff] %v560_v2  ;;  %v562_v5 = vadd.f32 %v561_v4, %v512_v3 }
 0x1f0   : > { %v563_v6 = vpop.f32.mrf.mxu1 }
 0x1f1   : > { %568 = vst [vmem:[%s271_s14 + $0x10] sm:$0x1] %v562_v5  ;;  %v564_v7 = vadd.f32 %v563_v6, %v512_v3 }
 0x1f3   : > { %569 = vst [vmem:[%s271_s14 + $0x18] sm:$0x1] %v564_v7 }
 0x1f4 PF: > { %s18_s23 = sadd.s32 1, %s877_s23   ;;  %s1066_s18 = smov %s861_s19 }
 0x1f5   : > { %p15_p8 = scmp.ge.s32.totalorder %s18_s23, 4   ;;  %s1067_s19 = smov %s865_s20 }
 0x1f6   : > { %s1068_s20 = smov %s958_s29  ;;  %s1069_s21 = smov %s873_s22 }
 0x1f7   : > { %s1070_s22 = smov %s1072_s25  ;;  %17 = sbr.rel (!%p15_p8) target bundleno = 4 (0x4), region = 80 }
 0x1fc   :  { %600 = vsyncpa [#allocation3], 1 }
 0x1fd   :  { %602 = vsyncpa [#allocation3 + $0x1], 1 }

</bundles_post_ra>
